<compile_context>
chip_gen: v7x
topology: tpu7x:2x2x1
jax: 0.10.0
libtpu: 0.0.40
codegen_flags: <defaults>
</compile_context>

<pallas_src>
import math
import functools

import jax
import jax.numpy as jnp
from jax.experimental import pallas as pl
from jax.experimental.pallas import tpu as pltpu


# ---------------------------------------------------------------------------
# Pallas kernel: fc1 -> noisy_fc2 -> fused noisy (adv|val) head -> dueling mix
# All operands are feature-major: x (n_in, bm), out (n_out, bm).
# ---------------------------------------------------------------------------
def net_kernel(x_ref, w1_ref, b1_ref, w2_ref, b2_ref, wh_ref, bh_ref,
               out_ref, *, n_out):
    f32 = jnp.float32
    bf16 = jnp.bfloat16

    x = x_ref[...].astype(bf16)                                       # (n_in, bm)

    # fc1 + ReLU
    h1 = jnp.dot(w1_ref[...], x, preferred_element_type=f32) + b1_ref[...]
    h1 = jnp.maximum(h1, 0.0)                                         # (n_mid, bm)

    # noisy_fc2 + ReLU (effective weight/bias precomposed at reset_noise time)
    h2 = jnp.dot(w2_ref[...], h1.astype(bf16),
                 preferred_element_type=f32) + b2_ref[...]
    h2 = jnp.maximum(h2, 0.0)                                         # (n_mid, bm)

    # fused noisy head: rows [0:n_out] = advantage, row [n_out] = value
    av = jnp.dot(wh_ref[...], h2.astype(bf16),
                 preferred_element_type=f32) + bh_ref[...]            # (n_out+1, bm)

    adv = av[:n_out, :]                                               # (n_out, bm)
    val = av[n_out:n_out + 1, :]                                      # (1, bm)

    # dueling combine: val + adv - mean(adv)   (mean over n_out sublanes)
    out_ref[...] = val + adv - jnp.mean(adv, axis=0, keepdims=True)


# ---------------------------------------------------------------------------
# Wrapper
# ---------------------------------------------------------------------------
def _choose_bm(B):
    """Batch-tile size (lane width of each block)."""
    # Small or awkward batches: one resident block -> no pipelining overhead.
    if B < 256 or B % 128 != 0:
        return B
    # Large batches: keep the grid shallow (per-step fixed cost dominates at
    # ~2.5 KFLOP/row) but >= 2 blocks so "parallel" shards across both
    # TensorCores on v7x.  Cap at 2048 lanes per block.
    bm = min(B // 2, 2048)
    bm = max((bm // 128) * 128, 128)
    while B % bm != 0:           # B % 128 == 0 guarantees termination at 128
        bm -= 128
    return bm


def net_forward(x, params, n_out):
    """x: (B, n_in) float32 -> (B, n_out) float32."""
    B, n_in = x.shape
    bm = _choose_bm(B)
    grid = (B // bm,)

    x_t = x.T                                                          # (n_in, B)

    const_keys = ("w1", "b1", "w2", "b2", "wh", "bh")

    def const_spec(shape, buffered):
        kwargs = {"pipeline_mode": pl.Buffered(1)} if buffered else {}
        return pl.BlockSpec(shape, lambda i, _nd=len(shape): (0,) * _nd, **kwargs)

    def build(buffered):
        in_specs = [pl.BlockSpec((n_in, bm), lambda i: (0, i))]
        in_specs += [const_spec(params[k].shape, buffered) for k in const_keys]
        out_spec = pl.BlockSpec((n_out, bm), lambda i: (0, i))
        return pl.pallas_call(
            functools.partial(net_kernel, n_out=n_out),
            out_shape=jax.ShapeDtypeStruct((n_out, B), jnp.float32),
            grid=grid,
            in_specs=in_specs,
            out_specs=out_spec,
            compiler_params=pltpu.CompilerParams(
                dimension_semantics=("parallel",)),
        )

    args = (x_t,) + tuple(params[k] for k in const_keys)
    try:
        out_t = build(buffered=True)(*args)
    except Exception:
        # Fallback if pipeline_mode=pl.Buffered(1) is not supported here.
        out_t = build(buffered=False)(*args)
    return out_t.T                                                     # (B, n_out)


# ---------------------------------------------------------------------------
# Parameter construction (mirrors PyTorch __init__ / reset_parameters /
# reset_noise).  Effective noisy weights/biases are composed HERE, once per
# reset_noise, not per forward — exactly matching the module's semantics
# between reset_noise() calls.
# ---------------------------------------------------------------------------
def _scale_noise(key, size):
    v = jax.random.normal(key, (size,), dtype=jnp.float32)
    return jnp.sign(v) * jnp.sqrt(jnp.abs(v))


def make_noisy_linear(key, in_features, out_features, std_init=0.4,
                      is_training=True):
    k_wmu, k_bmu, k_ein, k_eout, k_beps = jax.random.split(key, 5)
    mu_range = 1.0 / math.sqrt(in_features)

    weight_mu = jax.random.uniform(k_wmu, (out_features, in_features),
                                   minval=-mu_range, maxval=mu_range,
                                   dtype=jnp.float32)
    weight_sigma = jnp.full((out_features, in_features),
                            std_init / math.sqrt(in_features), dtype=jnp.float32)
    bias_mu = jax.random.uniform(k_bmu, (out_features,),
                                 minval=-mu_range, maxval=mu_range,
                                 dtype=jnp.float32)
    bias_sigma = jnp.full((out_features,),
                          std_init / math.sqrt(out_features), dtype=jnp.float32)

    eps_in = _scale_noise(k_ein, in_features)
    eps_out = _scale_noise(k_eout, out_features)
    # PyTorch reset_noise draws an INDEPENDENT bias_epsilon (not eps_out).
    bias_eps = _scale_noise(k_beps, out_features)

    if is_training:
        w_eff = weight_mu + weight_sigma * jnp.outer(eps_out, eps_in)
        b_eff = bias_mu + bias_sigma * bias_eps
    else:                                    # eval: weight = mu, bias = mu
        w_eff = weight_mu
        b_eff = bias_mu
    return w_eff, b_eff                       # (out, in), (out,)


def make_linear(key, in_features, out_features):
    # PyTorch nn.Linear default init: U(-1/sqrt(in), 1/sqrt(in)) for W and b.
    k_w, k_b = jax.random.split(key)
    bound = 1.0 / math.sqrt(in_features)
    w = jax.random.uniform(k_w, (out_features, in_features),
                           minval=-bound, maxval=bound, dtype=jnp.float32)
    b = jax.random.uniform(k_b, (out_features,),
                           minval=-bound, maxval=bound, dtype=jnp.float32)
    return w, b


def make_net_params(key, n_in, n_mid, n_out, is_training=True):
    k1, k2, k3, k4 = jax.random.split(key, 4)
    w1, b1 = make_linear(k1, n_in, n_mid)                       # (n_mid, n_in)
    w2, b2 = make_noisy_linear(k2, n_mid, n_mid, is_training=is_training)
    wa, ba = make_noisy_linear(k3, n_mid, n_out, is_training=is_training)
    wv, bv = make_noisy_linear(k4, n_mid, 1, is_training=is_training)

    # Fused head along the output (row) dim: rows [0:n_out]=adv, [n_out]=value.
    wh = jnp.concatenate([wa, wv], axis=0)                      # (n_out+1, n_mid)
    bh = jnp.concatenate([ba, bv], axis=0)                      # (n_out+1,)

    bf16 = jnp.bfloat16
    return {
        "w1": w1.astype(bf16),          # (n_mid, n_in)  bf16
        "b1": b1[:, None],              # (n_mid, 1)     f32
        "w2": w2.astype(bf16),          # (n_mid, n_mid) bf16
        "b2": b2[:, None],              # (n_mid, 1)     f32
        "wh": wh.astype(bf16),          # (n_out+1, n_mid) bf16
        "bh": bh[:, None],              # (n_out+1, 1)   f32
    }


# ---------------------------------------------------------------------------
# Pure-JAX reference (f32 math, same stored params) for correctness check
# ---------------------------------------------------------------------------
def net_forward_ref(x, p, n_out):
    w1 = p["w1"].astype(jnp.float32)
    w2 = p["w2"].astype(jnp.float32)
    wh = p["wh"].astype(jnp.float32)
    h1 = jnp.maximum(x @ w1.T + p["b1"][:, 0], 0.0)
    h2 = jnp.maximum(h1 @ w2.T + p["b2"][:, 0], 0.0)
    av = h2 @ wh.T + p["bh"][:, 0]
    adv = av[:, :n_out]
    val = av[:, n_out:n_out + 1]
    return val + adv - jnp.mean(adv, axis=1, keepdims=True)


if __name__ == "__main__":
    # CartPole-ish sizes: n_in=4 (state), n_mid=32, n_out=2 (actions)
    n_in, n_mid, n_out, batch = 4, 32, 2, 2

    key = jax.random.PRNGKey(0)
    k_params, k_x, k_xb = jax.random.split(key, 3)
    params = make_net_params(k_params, n_in, n_mid, n_out, is_training=True)

    # tiny inference-style batch (single resident block)
    x = jax.random.normal(k_x, (batch, n_in), dtype=jnp.float32)
    out = jax.block_until_ready(net_forward(x, params, n_out))
    ref = net_forward_ref(x, params, n_out)
    assert out.shape == (batch, n_out), out.shape
    assert jnp.allclose(out, ref, atol=5e-2, rtol=5e-2), (out, ref)

    # training-style batch: 1024 rows -> 2 blocks of 512 lanes ("parallel")
    xb = jax.random.normal(k_xb, (1024, n_in), dtype=jnp.float32)
    outb = jax.block_until_ready(net_forward(xb, params, n_out))
    refb = net_forward_ref(xb, params, n_out)
    assert outb.shape == (1024, n_out), outb.shape
    assert jnp.allclose(outb, refb, atol=5e-2, rtol=5e-2)

    print("KERNEL_OK")
</pallas_src>

<mosaic_0001>
module attributes {stable_mosaic.version = 11 : i64} {
  func.func @net_kernel(%arg0: i32, %arg1: memref<4x2xf32, #tpu.memory_space<vmem>>, %arg2: memref<32x4xbf16, #tpu.memory_space<vmem>>, %arg3: memref<32x1xf32, #tpu.memory_space<vmem>>, %arg4: memref<32x32xbf16, #tpu.memory_space<vmem>>, %arg5: memref<32x1xf32, #tpu.memory_space<vmem>>, %arg6: memref<3x32xbf16, #tpu.memory_space<vmem>>, %arg7: memref<3x1xf32, #tpu.memory_space<vmem>>, %arg8: memref<2x2xf32, #tpu.memory_space<vmem>>) attributes {dimension_semantics = [#tpu.dimension_semantics<parallel>], iteration_bounds = array<i64: 1>, scalar_prefetch = 0 : i64, scratch_operands = 0 : i64, tpu.core_type = #tpu.core_type<tc>, window_params = [{transform_indices = @transform_0, window_bounds = array<i64: 4, 2>}, {pipeline_mode = #tpu.pipeline_mode<synchronous>, transform_indices = @transform_1, window_bounds = array<i64: 32, 4>}, {pipeline_mode = #tpu.pipeline_mode<synchronous>, transform_indices = @transform_2, window_bounds = array<i64: 32, 1>}, {pipeline_mode = #tpu.pipeline_mode<synchronous>, transform_indices = @transform_3, window_bounds = array<i64: 32, 32>}, {pipeline_mode = #tpu.pipeline_mode<synchronous>, transform_indices = @transform_4, window_bounds = array<i64: 32, 1>}, {pipeline_mode = #tpu.pipeline_mode<synchronous>, transform_indices = @transform_5, window_bounds = array<i64: 3, 32>}, {pipeline_mode = #tpu.pipeline_mode<synchronous>, transform_indices = @transform_6, window_bounds = array<i64: 3, 1>}, {transform_indices = @transform_7, window_bounds = array<i64: 2, 2>}]} {
    %c0 = arith.constant 0 : index
    %c0_0 = arith.constant 0 : index
    %0 = vector.load %arg1[%c0, %c0_0] : memref<4x2xf32, #tpu.memory_space<vmem>>, vector<4x2xf32>
    %1 = arith.truncf %0 : vector<4x2xf32> to vector<4x2xbf16>
    %c0_1 = arith.constant 0 : index
    %c0_2 = arith.constant 0 : index
    %2 = vector.load %arg2[%c0_1, %c0_2] : memref<32x4xbf16, #tpu.memory_space<vmem>>, vector<32x4xbf16>
    %cst = arith.constant dense<0.000000e+00> : vector<32x2xf32>
    %3 = tpu.matmul %2, %1, %cst {dimension_numbers = #tpu.dot_dimension_numbers<[1], [0], [0], [1], [0, 0, 1, 1], [], []>} : vector<32x4xbf16>, vector<4x2xbf16>, vector<32x2xf32> -> vector<32x2xf32>
    %c0_3 = arith.constant 0 : index
    %c0_4 = arith.constant 0 : index
    %4 = vector.load %arg3[%c0_3, %c0_4] : memref<32x1xf32, #tpu.memory_space<vmem>>, vector<32x1xf32>
    %5 = vector.broadcast %4 : vector<32x1xf32> to vector<32x2xf32>
    %6 = arith.addf %3, %5 : vector<32x2xf32>
    %cst_5 = arith.constant 0.000000e+00 : f32
    %7 = vector.broadcast %cst_5 : f32 to vector<32x2xf32>
    %8 = arith.maximumf %6, %7 : vector<32x2xf32>
    %c0_6 = arith.constant 0 : index
    %c0_7 = arith.constant 0 : index
    %9 = vector.load %arg4[%c0_6, %c0_7] : memref<32x32xbf16, #tpu.memory_space<vmem>>, vector<32x32xbf16>
    %10 = arith.truncf %8 : vector<32x2xf32> to vector<32x2xbf16>
    %cst_8 = arith.constant dense<0.000000e+00> : vector<32x2xf32>
    %11 = tpu.matmul %9, %10, %cst_8 {dimension_numbers = #tpu.dot_dimension_numbers<[1], [0], [0], [1], [0, 0, 1, 1], [], []>} : vector<32x32xbf16>, vector<32x2xbf16>, vector<32x2xf32> -> vector<32x2xf32>
    %c0_9 = arith.constant 0 : index
    %c0_10 = arith.constant 0 : index
    %12 = vector.load %arg5[%c0_9, %c0_10] : memref<32x1xf32, #tpu.memory_space<vmem>>, vector<32x1xf32>
    %13 = vector.broadcast %12 : vector<32x1xf32> to vector<32x2xf32>
    %14 = arith.addf %11, %13 : vector<32x2xf32>
    %cst_11 = arith.constant 0.000000e+00 : f32
    %15 = vector.broadcast %cst_11 : f32 to vector<32x2xf32>
    %16 = arith.maximumf %14, %15 : vector<32x2xf32>
    %c0_12 = arith.constant 0 : index
    %c0_13 = arith.constant 0 : index
    %17 = vector.load %arg6[%c0_12, %c0_13] : memref<3x32xbf16, #tpu.memory_space<vmem>>, vector<3x32xbf16>
    %18 = arith.truncf %16 : vector<32x2xf32> to vector<32x2xbf16>
    %cst_14 = arith.constant dense<0.000000e+00> : vector<3x2xf32>
    %19 = tpu.matmul %17, %18, %cst_14 {dimension_numbers = #tpu.dot_dimension_numbers<[1], [0], [0], [1], [0, 0, 1, 1], [], []>} : vector<3x32xbf16>, vector<32x2xbf16>, vector<3x2xf32> -> vector<3x2xf32>
    %c0_15 = arith.constant 0 : index
    %c0_16 = arith.constant 0 : index
    %20 = vector.load %arg7[%c0_15, %c0_16] : memref<3x1xf32, #tpu.memory_space<vmem>>, vector<3x1xf32>
    %21 = vector.broadcast %20 : vector<3x1xf32> to vector<3x2xf32>
    %22 = arith.addf %19, %21 : vector<3x2xf32>
    %23 = vector.extract_strided_slice %22 {offsets = [0, 0], sizes = [2, 2], strides = [1, 1]} : vector<3x2xf32> to vector<2x2xf32>
    %24 = vector.extract_strided_slice %22 {offsets = [2, 0], sizes = [1, 2], strides = [1, 1]} : vector<3x2xf32> to vector<1x2xf32>
    %25 = vector.broadcast %24 : vector<1x2xf32> to vector<2x2xf32>
    %26 = arith.addf %25, %23 : vector<2x2xf32>
    %cst_17 = arith.constant dense<0.000000e+00> : vector<2xf32>
    %27 = vector.multi_reduction <add>, %23, %cst_17 [0] : vector<2x2xf32> to vector<2xf32>
    %28 = vector.shape_cast %27 : vector<2xf32> to vector<1x2xf32>
    %cst_18 = arith.constant 2.000000e+00 : f32
    %29 = vector.broadcast %cst_18 : f32 to vector<1x2xf32>
    %30 = arith.divf %28, %29 : vector<1x2xf32>
    %31 = vector.broadcast %30 : vector<1x2xf32> to vector<2x2xf32>
    %32 = arith.subf %26, %31 : vector<2x2xf32>
    %c0_19 = arith.constant 0 : index
    %c0_20 = arith.constant 0 : index
    %33 = vector.load %arg8[%c0_19, %c0_20] : memref<2x2xf32, #tpu.memory_space<vmem>>, vector<2x2xf32>
    tpu.vector_store %arg8[%c0_19, %c0_20], %32 {strides = array<i32>} : memref<2x2xf32, #tpu.memory_space<vmem>>, vector<2x2xf32>,
    return
  }
  func.func @transform_0(%arg0: i32) -> (i32, i32) {
    %c0_i32 = arith.constant 0 : i32
    %c0_i32_0 = arith.constant 0 : i32
    return %c0_i32, %arg0 : i32, i32
  }
  func.func @transform_1(%arg0: i32) -> (i32, i32) {
    %c0_i32 = arith.constant 0 : i32
    %c0_i32_0 = arith.constant 0 : i32
    %c0_i32_1 = arith.constant 0 : i32
    return %c0_i32, %c0_i32_0 : i32, i32
  }
  func.func @transform_2(%arg0: i32) -> (i32, i32) {
    %c0_i32 = arith.constant 0 : i32
    %c0_i32_0 = arith.constant 0 : i32
    %c0_i32_1 = arith.constant 0 : i32
    return %c0_i32, %c0_i32_0 : i32, i32
  }
  func.func @transform_3(%arg0: i32) -> (i32, i32) {
    %c0_i32 = arith.constant 0 : i32
    %c0_i32_0 = arith.constant 0 : i32
    %c0_i32_1 = arith.constant 0 : i32
    return %c0_i32, %c0_i32_0 : i32, i32
  }
  func.func @transform_4(%arg0: i32) -> (i32, i32) {
    %c0_i32 = arith.constant 0 : i32
    %c0_i32_0 = arith.constant 0 : i32
    %c0_i32_1 = arith.constant 0 : i32
    return %c0_i32, %c0_i32_0 : i32, i32
  }
  func.func @transform_5(%arg0: i32) -> (i32, i32) {
    %c0_i32 = arith.constant 0 : i32
    %c0_i32_0 = arith.constant 0 : i32
    %c0_i32_1 = arith.constant 0 : i32
    return %c0_i32, %c0_i32_0 : i32, i32
  }
  func.func @transform_6(%arg0: i32) -> (i32, i32) {
    %c0_i32 = arith.constant 0 : i32
    %c0_i32_0 = arith.constant 0 : i32
    %c0_i32_1 = arith.constant 0 : i32
    return %c0_i32, %c0_i32_0 : i32, i32
  }
  func.func @transform_7(%arg0: i32) -> (i32, i32) {
    %c0_i32 = arith.constant 0 : i32
    %c0_i32_0 = arith.constant 0 : i32
    return %c0_i32, %arg0 : i32, i32
  }
}

module attributes {stable_mosaic.version = 11 : i64} {
  func.func @net_kernel(%arg0: i32, %arg1: memref<4x2xf32, #tpu.memory_space<vmem>>, %arg2: memref<32x4xbf16, #tpu.memory_space<vmem>>, %arg3: memref<32x1xf32, #tpu.memory_space<vmem>>, %arg4: memref<32x32xbf16, #tpu.memory_space<vmem>>, %arg5: memref<32x1xf32, #tpu.memory_space<vmem>>, %arg6: memref<3x32xbf16, #tpu.memory_space<vmem>>, %arg7: memref<3x1xf32, #tpu.memory_space<vmem>>, %arg8: memref<2x2xf32, #tpu.memory_space<vmem>>) attributes {dimension_semantics = [#tpu.dimension_semantics<parallel>], iteration_bounds = array<i64: 1>, scalar_prefetch = 0 : i64, scratch_operands = 0 : i64, tpu.core_type = #tpu.core_type<tc>, window_params = [{transform_indices = @transform_0, window_bounds = array<i64: 4, 2>}, {pipeline_mode = #tpu.pipeline_mode<synchronous>, transform_indices = @transform_1, window_bounds = array<i64: 32, 4>}, {pipeline_mode = #tpu.pipeline_mode<synchronous>, transform_indices = @transform_2, window_bounds = array<i64: 32, 1>}, {pipeline_mode = #tpu.pipeline_mode<synchronous>, transform_indices = @transform_3, window_bounds = array<i64: 32, 32>}, {pipeline_mode = #tpu.pipeline_mode<synchronous>, transform_indices = @transform_4, window_bounds = array<i64: 32, 1>}, {pipeline_mode = #tpu.pipeline_mode<synchronous>, transform_indices = @transform_5, window_bounds = array<i64: 3, 32>}, {pipeline_mode = #tpu.pipeline_mode<synchronous>, transform_indices = @transform_6, window_bounds = array<i64: 3, 1>}, {transform_indices = @transform_7, window_bounds = array<i64: 2, 2>}]} {
    %c0 = arith.constant 0 : index
    %c0_0 = arith.constant 0 : index
    %0 = vector.load %arg1[%c0, %c0_0] : memref<4x2xf32, #tpu.memory_space<vmem>>, vector<4x2xf32>
    %1 = arith.truncf %0 : vector<4x2xf32> to vector<4x2xbf16>
    %c0_1 = arith.constant 0 : index
    %c0_2 = arith.constant 0 : index
    %2 = vector.load %arg2[%c0_1, %c0_2] : memref<32x4xbf16, #tpu.memory_space<vmem>>, vector<32x4xbf16>
    %cst = arith.constant dense<0.000000e+00> : vector<32x2xf32>
    %3 = tpu.matmul %2, %1, %cst {dimension_numbers = #tpu.dot_dimension_numbers<[1], [0], [0], [1], [0, 0, 1, 1], [], []>} : vector<32x4xbf16>, vector<4x2xbf16>, vector<32x2xf32> -> vector<32x2xf32>
    %c0_3 = arith.constant 0 : index
    %c0_4 = arith.constant 0 : index
    %4 = vector.load %arg3[%c0_3, %c0_4] : memref<32x1xf32, #tpu.memory_space<vmem>>, vector<32x1xf32>
    %5 = vector.broadcast %4 : vector<32x1xf32> to vector<32x2xf32>
    %6 = arith.addf %3, %5 : vector<32x2xf32>
    %cst_5 = arith.constant 0.000000e+00 : f32
    %7 = vector.broadcast %cst_5 : f32 to vector<32x2xf32>
    %8 = arith.maximumf %6, %7 : vector<32x2xf32>
    %c0_6 = arith.constant 0 : index
    %c0_7 = arith.constant 0 : index
    %9 = vector.load %arg4[%c0_6, %c0_7] : memref<32x32xbf16, #tpu.memory_space<vmem>>, vector<32x32xbf16>
    %10 = arith.truncf %8 : vector<32x2xf32> to vector<32x2xbf16>
    %cst_8 = arith.constant dense<0.000000e+00> : vector<32x2xf32>
    %11 = tpu.matmul %9, %10, %cst_8 {dimension_numbers = #tpu.dot_dimension_numbers<[1], [0], [0], [1], [0, 0, 1, 1], [], []>} : vector<32x32xbf16>, vector<32x2xbf16>, vector<32x2xf32> -> vector<32x2xf32>
    %c0_9 = arith.constant 0 : index
    %c0_10 = arith.constant 0 : index
    %12 = vector.load %arg5[%c0_9, %c0_10] : memref<32x1xf32, #tpu.memory_space<vmem>>, vector<32x1xf32>
    %13 = vector.broadcast %12 : vector<32x1xf32> to vector<32x2xf32>
    %14 = arith.addf %11, %13 : vector<32x2xf32>
    %cst_11 = arith.constant 0.000000e+00 : f32
    %15 = vector.broadcast %cst_11 : f32 to vector<32x2xf32>
    %16 = arith.maximumf %14, %15 : vector<32x2xf32>
    %c0_12 = arith.constant 0 : index
    %c0_13 = arith.constant 0 : index
    %17 = vector.load %arg6[%c0_12, %c0_13] : memref<3x32xbf16, #tpu.memory_space<vmem>>, vector<3x32xbf16>
    %18 = arith.truncf %16 : vector<32x2xf32> to vector<32x2xbf16>
    %cst_14 = arith.constant dense<0.000000e+00> : vector<3x2xf32>
    %19 = tpu.matmul %17, %18, %cst_14 {dimension_numbers = #tpu.dot_dimension_numbers<[1], [0], [0], [1], [0, 0, 1, 1], [], []>} : vector<3x32xbf16>, vector<32x2xbf16>, vector<3x2xf32> -> vector<3x2xf32>
    %c0_15 = arith.constant 0 : index
    %c0_16 = arith.constant 0 : index
    %20 = vector.load %arg7[%c0_15, %c0_16] : memref<3x1xf32, #tpu.memory_space<vmem>>, vector<3x1xf32>
    %21 = vector.broadcast %20 : vector<3x1xf32> to vector<3x2xf32>
    %22 = arith.addf %19, %21 : vector<3x2xf32>
    %23 = vector.extract_strided_slice %22 {offsets = [0, 0], sizes = [2, 2], strides = [1, 1]} : vector<3x2xf32> to vector<2x2xf32>
    %24 = vector.extract_strided_slice %22 {offsets = [2, 0], sizes = [1, 2], strides = [1, 1]} : vector<3x2xf32> to vector<1x2xf32>
    %25 = vector.broadcast %24 : vector<1x2xf32> to vector<2x2xf32>
    %26 = arith.addf %25, %23 : vector<2x2xf32>
    %cst_17 = arith.constant dense<0.000000e+00> : vector<2xf32>
    %27 = vector.multi_reduction <add>, %23, %cst_17 [0] : vector<2x2xf32> to vector<2xf32>
    %28 = vector.shape_cast %27 : vector<2xf32> to vector<1x2xf32>
    %cst_18 = arith.constant 2.000000e+00 : f32
    %29 = vector.broadcast %cst_18 : f32 to vector<1x2xf32>
    %30 = arith.divf %28, %29 : vector<1x2xf32>
    %31 = vector.broadcast %30 : vector<1x2xf32> to vector<2x2xf32>
    %32 = arith.subf %26, %31 : vector<2x2xf32>
    %c0_19 = arith.constant 0 : index
    %c0_20 = arith.constant 0 : index
    %33 = vector.load %arg8[%c0_19, %c0_20] : memref<2x2xf32, #tpu.memory_space<vmem>>, vector<2x2xf32>
    tpu.vector_store %arg8[%c0_19, %c0_20], %32 {strides = array<i32>} : memref<2x2xf32, #tpu.memory_space<vmem>>, vector<2x2xf32>,
    return
  }
  func.func @transform_0(%arg0: i32) -> (i32, i32) {
    %c0_i32 = arith.constant 0 : i32
    %c0_i32_0 = arith.constant 0 : i32
    return %c0_i32, %arg0 : i32, i32
  }
  func.func @transform_1(%arg0: i32) -> (i32, i32) {
    %c0_i32 = arith.constant 0 : i32
    %c0_i32_0 = arith.constant 0 : i32
    %c0_i32_1 = arith.constant 0 : i32
    return %c0_i32, %c0_i32_0 : i32, i32
  }
  func.func @transform_2(%arg0: i32) -> (i32, i32) {
    %c0_i32 = arith.constant 0 : i32
    %c0_i32_0 = arith.constant 0 : i32
    %c0_i32_1 = arith.constant 0 : i32
    return %c0_i32, %c0_i32_0 : i32, i32
  }
  func.func @transform_3(%arg0: i32) -> (i32, i32) {
    %c0_i32 = arith.constant 0 : i32
    %c0_i32_0 = arith.constant 0 : i32
    %c0_i32_1 = arith.constant 0 : i32
    return %c0_i32, %c0_i32_0 : i32, i32
  }
  func.func @transform_4(%arg0: i32) -> (i32, i32) {
    %c0_i32 = arith.constant 0 : i32
    %c0_i32_0 = arith.constant 0 : i32
    %c0_i32_1 = arith.constant 0 : i32
    return %c0_i32, %c0_i32_0 : i32, i32
  }
  func.func @transform_5(%arg0: i32) -> (i32, i32) {
    %c0_i32 = arith.constant 0 : i32
    %c0_i32_0 = arith.constant 0 : i32
    %c0_i32_1 = arith.constant 0 : i32
    return %c0_i32, %c0_i32_0 : i32, i32
  }
  func.func @transform_6(%arg0: i32) -> (i32, i32) {
    %c0_i32 = arith.constant 0 : i32
    %c0_i32_0 = arith.constant 0 : i32
    %c0_i32_1 = arith.constant 0 : i32
    return %c0_i32, %c0_i32_0 : i32, i32
  }
  func.func @transform_7(%arg0: i32) -> (i32, i32) {
    %c0_i32 = arith.constant 0 : i32
    %c0_i32_0 = arith.constant 0 : i32
    return %c0_i32, %arg0 : i32, i32
  }
}

</mosaic_0001>

<bundles_post_ra>
// kernel: tpu_custom_call.1
= control target key start
LH: loop header
LB: loop body
LE: loop exit
PB: predicated region body
PF: predicated region fallthrough
CT: control target
= control target key end

     0   :  { %vm75_vm0 = vcmask 1041408   ;;  %vm68_vm1 = vcmask 31744   ;;  %v391_v6 = vmov 0   ;;  %s497_s0 = inlined_call_operand.vmem [shape: f32[4,2], index: 0, kind: input, shape index: {}]   ;;  %s498_s1 = inlined_call_operand.vmem [shape: bf16[32,4], index: 1, kind: input, shape index: {}]   ;;  %s499_s2 = inlined_call_operand.vmem [shape: f32[32,1], index: 2, kind: input, shape index: {}]   ;;  %s500_s3 = inlined_call_operand.vmem [shape: bf16[32,32], index: 3, kind: input, shape index: {}]   ;;  %s501_s4 = inlined_call_operand.vmem [shape: f32[32,1], index: 4, kind: input, shape index: {}]   ;;  %s502_s5 = inlined_call_operand.vmem [shape: bf16[3,32], index: 5, kind: input, shape index: {}]   ;;  %s503_s6 = inlined_call_operand.vmem [shape: f32[3,1], index: 6, kind: input, shape index: {}]   ;;  %s504_s7 = inlined_call_operand.hbm [shape: f32[2,2], index: 7, kind: output, shape index: {}]  }
   0x1   :  { %v28_v0 = vld [vmem:[%s497_s0] sm:$0xf]  ;;  %v364_v5 = vld [vmem:[%s498_s1 + $0x8] sm:$0xff]   ;;  %361 = vset.pattern.permute.xlu0 %v391_v6  ;;  %v36_v7 = vld [vmem:[%s499_s2 + $0x10] sm:$0xff]  ;;  %362 = vset.pattern.permute.xlu1 %v391_v6 }
   0x2   :  { %v363_v1 = vld [vmem:[%s498_s1] sm:$0xff]   ;;  %v29_v2 = vpack.c.bf16 %v28_v0, %v28_v0  ;;  %v35_v8 = vld [vmem:[%s499_s2 + $0x8] sm:$0xff]  ;;  %50 = vperm.xlu1 %362, %v36_v7  }
   0x3   :  { %336 = vmatprep.mubr.msk.bf16.mxu0 %vm68_vm1, %v363_v1  ;;  %v34_v3 = vld [vmem:[%s499_s2] sm:$0xff] }
   0x4   :  { %356 = vmatprep.subr.msk.bf16.mxu0 %vm75_vm0, %v29_v2  ;;  %v77_v4 = vsel %vm75_vm0, %v29_v2, 0  ;;  %40 = vperm.xlu0 %361, %v34_v3  }
   0x5   :  { %335 = vmatpush3.bf16.msra.mxu0 %v77_v4 }
   0x6   :  { %12 = vsyncpa [#allocation3], 0  ;;  %v37_v9 = vld [vmem:[%s499_s2 + $0x18] sm:$0xff]  ;;  %v138_v10 = vld [vmem:[%s501_s4] sm:$0xff]  ;;  %vm172_vm2 = vcmask 261120   ;;  %v392_v35 = vmov 0.0   ;;  %v284_v57 = vlaneseq }
   0x7   :  { %55 = vperm.xlu1 %362, %v37_v9   ;;  %v139_v11 = vld [vmem:[%s501_s4 + $0x8] sm:$0xff]  ;;  %v140_v12 = vld [vmem:[%s501_s4 + $0x10] sm:$0xff]  ;;  %v141_v13 = vld [vmem:[%s501_s4 + $0x18] sm:$0xff]  ;;  %348 = vmatprep.subr.bf16.mxu0 %v392_v35  ;;  %vm393_vm3 = vmmov 0   ;;  %vm289_vm4 = vcmask 9216  }
   0x8   :  { %337 = vmatmul.mubr.msk.bf16.vlgmr.msra.gmra.mrb[0].mxu0 %vm68_vm1, %v364_v5  ;;  %45 = vperm.xlu0 %361, %v35_v8   ;;  %v235_v14 = vld [vmem:[%s503_s6] sm:$0x7]  ;;  %v366_v34 = vld [vmem:[%s500_s3 + $0x8] sm:$0xff]   ;;  %v285_v63 = vshrl.u32 %v284_v57, 7 }
   0x9   :  { %v365_v15 = vld [vmem:[%s500_s3] sm:$0xff]   ;;  %352 = vmatprep.mubr.msk.bf16.mxu0 %vm393_vm3, %v392_v35 }
   0xa   :  { %344 = vmatprep.mubr.msk.bf16.mxu1 %vm172_vm2, %v365_v15  ;;  %v232_v54 = vld [vmem:[%s502_s5] sm:$0x3]  ;;  %v286_v2 = vsub.s32 2, %v285_v63  ;;  %s394_s5 = smov [#allocation2]  }
   0xb   :  { %149 = vperm.xlu1 %362, %v139_v11   ;;  %s307_s25 = sshll.u32 %s394_s5, 4  ;;  %s308_s25 = int_to_ptr.vmem [resolvable:$true] %s307_s25 }
   0xc   :  { %144 = vperm.xlu0 %361, %v138_v10   ;;  %s367_s26 = scalar_lea.vmem %s308_s25, 32  ;;  %p372_p1 = scmp.lt.s32.totalorder %s308_s25, %s308_s25 }
   0xd   :  { %p368_p0 = scmp.ne.s32.totalorder %s308_s25, %s367_s26  ;;  %p373_p2 = scmp.lt.s32.totalorder %s367_s26, %s367_s26 }
   0xf   :  { %159 = vperm.xlu1 %362, %v141_v13   ;;  %p374_p3 = por %p373_p2, %p372_p1 }
  0x10   :  { %154 = vperm.xlu0 %361, %v140_v12  }
  0x11   :  { %p375_p4 = pnand %p374_p3, %p368_p0 }
  0x14   :  { %238 = vperm.xlu0 %361, %v235_v14  }
  0x81   :  { %v51_v16 = vpop.permute.xlu1 %50 }
  0x83   :  { %v41_v17 = vpop.permute.xlu0 %40 }
  0x86   :  { %v56_v21 = vpop.permute.xlu1 %55 }
  0x87   :  { %v46_v24 = vpop.permute.xlu0 %45 }
  0x8a   :  { %v150_v37 = vpop.permute.xlu1 %149 }
  0x8b   :  { %v145_v36 = vpop.permute.xlu0 %144 }
  0x8e   :  { %v160_v42 = vpop.permute.xlu1 %159 }
  0x8f   :  { %v155_v38 = vpop.permute.xlu0 %154 }
  0x93   :  { %v239_v55 = vpop.permute.xlu0 %238 }
  0xdb   :  { %v338_v18 = vpop.f32.mrb[0].mxu0 }
  0xdc   :  { %v122_v19 = vadd.f32 %v338_v18, %v51_v16  ;;  %v113_v20 = vpop.f32.mrb[1].mxu0 }
  0xdd   :  { %v114_v22 = vadd.f32 %v113_v20, %v41_v17  ;;  %v339_v23 = vpop.f32.mrb[2].mxu0 }
  0xde   :  { %v125_v25 = vadd.f32 %v339_v23, %v56_v21  ;;  %v116_v26 = vpop.f32.mrb[3].mxu0  ;;  %v130_v28 = vmax.f32 %v122_v19, 0.0 }
  0xdf   :  { %v117_v27 = vadd.f32 %v116_v26, %v46_v24  ;;  %v128_v30 = vmax.f32 %v114_v22, 0.0 }
  0xe0   :  { %v131_v29 = vmax.f32 %v125_v25, 0.0 }
  0xe1   :  { %v129_v31 = vmax.f32 %v117_v27, 0.0 }
  0xe2   :  { %v137_v32 = vpack.c.bf16 %v131_v29, %v130_v28 }
  0xe3   :  { %v136_v33 = vpack.c.bf16 %v129_v31, %v128_v30 }
  0xe5   :  { %340 = vmatprep.subr.bf16.mxu1 %v136_v33 }
  0xe6   :  { %341 = vmatpush3.bf16.msra.mxu1 %v136_v33 }
  0xe7   :  { %342 = vmatprep.subr.bf16.mxu1 %v137_v32 }
  0xea   :  { %343 = vmatpush3.bf16.msra.mxu1 %v137_v32 }
  0xed   :  { %345 = vmatmul.mubr.msk.bf16.vlgmr.msra.gmra.mrb[0].mxu1 %vm172_vm2, %v366_v34 }
 0x1c0   :  { %v346_v39 = vpop.f32.mrb[0].mxu1 }
 0x1c1   :  { %v222_v40 = vadd.f32 %v346_v39, %v155_v38  ;;  %v213_v41 = vpop.f32.mrb[1].mxu1 }
 0x1c2   :  { %v214_v43 = vadd.f32 %v213_v41, %v145_v36  ;;  %v347_v44 = vpop.f32.mrb[2].mxu1 }
 0x1c3   :  { %v225_v45 = vadd.f32 %v347_v44, %v160_v42  ;;  %v216_v46 = vpop.f32.mrb[3].mxu1  ;;  %v230_v48 = vmax.f32 %v222_v40, 0.0 }
 0x1c4   :  { %v217_v47 = vadd.f32 %v216_v46, %v150_v37  ;;  %v228_v50 = vmax.f32 %v214_v43, 0.0 }
 0x1c5   :  { %v231_v49 = vmax.f32 %v225_v45, 0.0 }
 0x1c6   :  { %v229_v51 = vmax.f32 %v217_v47, 0.0 }
 0x1c7   :  { %v234_v52 = vpack.c.bf16 %v231_v49, %v230_v48 }
 0x1c8   :  { %v233_v53 = vpack.c.bf16 %v229_v51, %v228_v50 }
 0x1ca   :  { %349 = vmatpush3.bf16.msra.mxu0 %v233_v53 }
 0x1cb   :  { %350 = vmatprep.subr.bf16.mxu0 %v392_v35 }
 0x1ce   :  { %351 = vmatpush3.bf16.msra.mxu0 %v234_v52 }
 0x1d1   :  { %353 = vmatmul.mubr.msk.bf16.vlgmr.msra.gmra.mrb[4].mxu0 %vm172_vm2, %v232_v54 }
 0x2a4   :  { %v278_v56 = vpop.f32.mrb[4].mxu0 }
 0x2a5   :  { %v279_v58 = vadd.f32 %v278_v56, %v239_v55  ;;  %v354_v59 = vpop.f32.mrb[5].mxu0 }
 0x2a6   :  { %v281_v60 = vpop.f32.mrb[6].mxu0 }
 0x2a7   :  { %v355_v61 = vpop.f32.mrb[7].mxu0  ;;  %v290_v62 = vsel %vm289_vm4, %v279_v58, 0.0  ;;  %v287_v5 = vrot.slane %v279_v58, %v286_v2 }
 0x2a8   :  { %v291_v0 = vrot.slane %v290_v62, 4 }
 0x2a9   :  { %v288_v8 = vadd.f32 %v287_v5, %v279_v58 }
 0x2aa   :  { %v292_v1 = vadd.f32 %v291_v0, %v290_v62 }
 0x2ac   :  { %v293_v3 = vrot.slane %v292_v1, 2 }
 0x2ae   :  { %v294_v4 = vadd.f32 %v293_v3, %v292_v1 }
 0x2b0   :  { %v295_v6 = vrot.slane %v294_v4, 1 }
 0x2b2   :  { %v296_v7 = vadd.f32 %v295_v6, %v294_v4 }
 0x2b4   :  { %v298_v9 = vmul.f32 0.5, %v296_v7 }
 0x2b6   :  { %v299_v10 = vsub.f32 %v288_v8, %v298_v9 }
 0x2b8   :  { %300 = vst.msk [vmem:[#allocation2] sm:$0x3] %vm289_vm4, %v299_v10 }
 0x2b9   :  { %378 = shalt.err (!%p375_p4)
}
 0x2ba   :  { %s379_s29 = scalar_lea.hbm %s504_s7, 32 }
 0x2bb   :  { %p380_p5 = scmp.ne.s32.totalorder %s504_s7, %s379_s29  ;;  %p383_p6 = scmp.lt.u32.totalorder %s379_s29, %s504_s7 }
 0x2bd   :  { %p385_p7 = pnand %p383_p6, %p380_p5 }
 0x2bf   :  { %388 = shalt.err (!%p385_p7)
}
 0x2c0   :  { %310 = dma.vmem_to_hbm [thread:$0]  %s308_s25, 32, %s504_s7, [#allocation3]  }
 0x2c1   :  { %389 = dma.done.wait [#allocation3], 32  }
 0x2c2   :  { %390 = vsyncadd [#allocation3], 4294967264 }
 0x2c3   :  { %314 = vsyncpa [#allocation3], 1 }

// kernel: tpu_custom_call.1
= control target key start
LH: loop header
LB: loop body
LE: loop exit
PB: predicated region body
PF: predicated region fallthrough
CT: control target
= control target key end

     0   :  { %vm75_vm0 = vcmask 1041408   ;;  %vm68_vm1 = vcmask 31744   ;;  %v391_v6 = vmov 0   ;;  %s497_s0 = inlined_call_operand.vmem [shape: f32[4,2], index: 0, kind: input, shape index: {}]   ;;  %s498_s1 = inlined_call_operand.vmem [shape: bf16[32,4], index: 1, kind: input, shape index: {}]   ;;  %s499_s2 = inlined_call_operand.vmem [shape: f32[32,1], index: 2, kind: input, shape index: {}]   ;;  %s500_s3 = inlined_call_operand.vmem [shape: bf16[32,32], index: 3, kind: input, shape index: {}]   ;;  %s501_s4 = inlined_call_operand.vmem [shape: f32[32,1], index: 4, kind: input, shape index: {}]   ;;  %s502_s5 = inlined_call_operand.vmem [shape: bf16[3,32], index: 5, kind: input, shape index: {}]   ;;  %s503_s6 = inlined_call_operand.vmem [shape: f32[3,1], index: 6, kind: input, shape index: {}]   ;;  %s504_s7 = inlined_call_operand.hbm [shape: f32[2,2], index: 7, kind: output, shape index: {}]  }
   0x1   :  { %v28_v0 = vld [vmem:[%s497_s0] sm:$0xf]  ;;  %v364_v5 = vld [vmem:[%s498_s1 + $0x8] sm:$0xff]   ;;  %361 = vset.pattern.permute.xlu0 %v391_v6  ;;  %v36_v7 = vld [vmem:[%s499_s2 + $0x10] sm:$0xff]  ;;  %362 = vset.pattern.permute.xlu1 %v391_v6 }
   0x2   :  { %v363_v1 = vld [vmem:[%s498_s1] sm:$0xff]   ;;  %v29_v2 = vpack.c.bf16 %v28_v0, %v28_v0  ;;  %v35_v8 = vld [vmem:[%s499_s2 + $0x8] sm:$0xff]  ;;  %50 = vperm.xlu1 %362, %v36_v7  }
   0x3   :  { %336 = vmatprep.mubr.msk.bf16.mxu0 %vm68_vm1, %v363_v1  ;;  %v34_v3 = vld [vmem:[%s499_s2] sm:$0xff] }
   0x4   :  { %356 = vmatprep.subr.msk.bf16.mxu0 %vm75_vm0, %v29_v2  ;;  %v77_v4 = vsel %vm75_vm0, %v29_v2, 0  ;;  %40 = vperm.xlu0 %361, %v34_v3  }
   0x5   :  { %335 = vmatpush3.bf16.msra.mxu0 %v77_v4 }
   0x6   :  { %12 = vsyncpa [#allocation3], 0  ;;  %v37_v9 = vld [vmem:[%s499_s2 + $0x18] sm:$0xff]  ;;  %v138_v10 = vld [vmem:[%s501_s4] sm:$0xff]  ;;  %vm172_vm2 = vcmask 261120   ;;  %v392_v35 = vmov 0.0   ;;  %v284_v57 = vlaneseq }
   0x7   :  { %55 = vperm.xlu1 %362, %v37_v9   ;;  %v139_v11 = vld [vmem:[%s501_s4 + $0x8] sm:$0xff]  ;;  %v140_v12 = vld [vmem:[%s501_s4 + $0x10] sm:$0xff]  ;;  %v141_v13 = vld [vmem:[%s501_s4 + $0x18] sm:$0xff]  ;;  %348 = vmatprep.subr.bf16.mxu0 %v392_v35  ;;  %vm393_vm3 = vmmov 0   ;;  %vm289_vm4 = vcmask 9216  }
   0x8   :  { %337 = vmatmul.mubr.msk.bf16.vlgmr.msra.gmra.mrb[0].mxu0 %vm68_vm1, %v364_v5  ;;  %45 = vperm.xlu0 %361, %v35_v8   ;;  %v235_v14 = vld [vmem:[%s503_s6] sm:$0x7]  ;;  %v366_v34 = vld [vmem:[%s500_s3 + $0x8] sm:$0xff]   ;;  %v285_v63 = vshrl.u32 %v284_v57, 7 }
   0x9   :  { %v365_v15 = vld [vmem:[%s500_s3] sm:$0xff]   ;;  %352 = vmatprep.mubr.msk.bf16.mxu0 %vm393_vm3, %v392_v35 }
   0xa   :  { %344 = vmatprep.mubr.msk.bf16.mxu1 %vm172_vm2, %v365_v15  ;;  %v232_v54 = vld [vmem:[%s502_s5] sm:$0x3]  ;;  %v286_v2 = vsub.s32 2, %v285_v63  ;;  %s394_s5 = smov [#allocation2]  }
   0xb   :  { %149 = vperm.xlu1 %362, %v139_v11   ;;  %s307_s25 = sshll.u32 %s394_s5, 4  ;;  %s308_s25 = int_to_ptr.vmem [resolvable:$true] %s307_s25 }
   0xc   :  { %144 = vperm.xlu0 %361, %v138_v10   ;;  %s367_s26 = scalar_lea.vmem %s308_s25, 32  ;;  %p372_p1 = scmp.lt.s32.totalorder %s308_s25, %s308_s25 }
   0xd   :  { %p368_p0 = scmp.ne.s32.totalorder %s308_s25, %s367_s26  ;;  %p373_p2 = scmp.lt.s32.totalorder %s367_s26, %s367_s26 }
   0xf   :  { %159 = vperm.xlu1 %362, %v141_v13   ;;  %p374_p3 = por %p373_p2, %p372_p1 }
  0x10   :  { %154 = vperm.xlu0 %361, %v140_v12  }
  0x11   :  { %p375_p4 = pnand %p374_p3, %p368_p0 }
  0x14   :  { %238 = vperm.xlu0 %361, %v235_v14  }
  0x81   :  { %v51_v16 = vpop.permute.xlu1 %50 }
  0x83   :  { %v41_v17 = vpop.permute.xlu0 %40 }
  0x86   :  { %v56_v21 = vpop.permute.xlu1 %55 }
  0x87   :  { %v46_v24 = vpop.permute.xlu0 %45 }
  0x8a   :  { %v150_v37 = vpop.permute.xlu1 %149 }
  0x8b   :  { %v145_v36 = vpop.permute.xlu0 %144 }
  0x8e   :  { %v160_v42 = vpop.permute.xlu1 %159 }
  0x8f   :  { %v155_v38 = vpop.permute.xlu0 %154 }
  0x93   :  { %v239_v55 = vpop.permute.xlu0 %238 }
  0xdb   :  { %v338_v18 = vpop.f32.mrb[0].mxu0 }
  0xdc   :  { %v122_v19 = vadd.f32 %v338_v18, %v51_v16  ;;  %v113_v20 = vpop.f32.mrb[1].mxu0 }
  0xdd   :  { %v114_v22 = vadd.f32 %v113_v20, %v41_v17  ;;  %v339_v23 = vpop.f32.mrb[2].mxu0 }
  0xde   :  { %v125_v25 = vadd.f32 %v339_v23, %v56_v21  ;;  %v116_v26 = vpop.f32.mrb[3].mxu0  ;;  %v130_v28 = vmax.f32 %v122_v19, 0.0 }
  0xdf   :  { %v117_v27 = vadd.f32 %v116_v26, %v46_v24  ;;  %v128_v30 = vmax.f32 %v114_v22, 0.0 }
  0xe0   :  { %v131_v29 = vmax.f32 %v125_v25, 0.0 }
  0xe1   :  { %v129_v31 = vmax.f32 %v117_v27, 0.0 }
  0xe2   :  { %v137_v32 = vpack.c.bf16 %v131_v29, %v130_v28 }
  0xe3   :  { %v136_v33 = vpack.c.bf16 %v129_v31, %v128_v30 }
  0xe5   :  { %340 = vmatprep.subr.bf16.mxu1 %v136_v33 }
  0xe6   :  { %341 = vmatpush3.bf16.msra.mxu1 %v136_v33 }
  0xe7   :  { %342 = vmatprep.subr.bf16.mxu1 %v137_v32 }
  0xea   :  { %343 = vmatpush3.bf16.msra.mxu1 %v137_v32 }
  0xed   :  { %345 = vmatmul.mubr.msk.bf16.vlgmr.msra.gmra.mrb[0].mxu1 %vm172_vm2, %v366_v34 }
 0x1c0   :  { %v346_v39 = vpop.f32.mrb[0].mxu1 }
 0x1c1   :  { %v222_v40 = vadd.f32 %v346_v39, %v155_v38  ;;  %v213_v41 = vpop.f32.mrb[1].mxu1 }
 0x1c2   :  { %v214_v43 = vadd.f32 %v213_v41, %v145_v36  ;;  %v347_v44 = vpop.f32.mrb[2].mxu1 }
 0x1c3   :  { %v225_v45 = vadd.f32 %v347_v44, %v160_v42  ;;  %v216_v46 = vpop.f32.mrb[3].mxu1  ;;  %v230_v48 = vmax.f32 %v222_v40, 0.0 }
 0x1c4   :  { %v217_v47 = vadd.f32 %v216_v46, %v150_v37  ;;  %v228_v50 = vmax.f32 %v214_v43, 0.0 }
 0x1c5   :  { %v231_v49 = vmax.f32 %v225_v45, 0.0 }
 0x1c6   :  { %v229_v51 = vmax.f32 %v217_v47, 0.0 }
 0x1c7   :  { %v234_v52 = vpack.c.bf16 %v231_v49, %v230_v48 }
 0x1c8   :  { %v233_v53 = vpack.c.bf16 %v229_v51, %v228_v50 }
 0x1ca   :  { %349 = vmatpush3.bf16.msra.mxu0 %v233_v53 }
 0x1cb   :  { %350 = vmatprep.subr.bf16.mxu0 %v392_v35 }
 0x1ce   :  { %351 = vmatpush3.bf16.msra.mxu0 %v234_v52 }
 0x1d1   :  { %353 = vmatmul.mubr.msk.bf16.vlgmr.msra.gmra.mrb[4].mxu0 %vm172_vm2, %v232_v54 }
 0x2a4   :  { %v278_v56 = vpop.f32.mrb[4].mxu0 }
 0x2a5   :  { %v279_v58 = vadd.f32 %v278_v56, %v239_v55  ;;  %v354_v59 = vpop.f32.mrb[5].mxu0 }
 0x2a6   :  { %v281_v60 = vpop.f32.mrb[6].mxu0 }
 0x2a7   :  { %v355_v61 = vpop.f32.mrb[7].mxu0  ;;  %v290_v62 = vsel %vm289_vm4, %v279_v58, 0.0  ;;  %v287_v5 = vrot.slane %v279_v58, %v286_v2 }
 0x2a8   :  { %v291_v0 = vrot.slane %v290_v62, 4 }
 0x2a9   :  { %v288_v8 = vadd.f32 %v287_v5, %v279_v58 }
 0x2aa   :  { %v292_v1 = vadd.f32 %v291_v0, %v290_v62 }
 0x2ac   :  { %v293_v3 = vrot.slane %v292_v1, 2 }
 0x2ae   :  { %v294_v4 = vadd.f32 %v293_v3, %v292_v1 }
 0x2b0   :  { %v295_v6 = vrot.slane %v294_v4, 1 }
 0x2b2   :  { %v296_v7 = vadd.f32 %v295_v6, %v294_v4 }
 0x2b4   :  { %v298_v9 = vmul.f32 0.5, %v296_v7 }
 0x2b6   :  { %v299_v10 = vsub.f32 %v288_v8, %v298_v9 }
 0x2b8   :  { %300 = vst.msk [vmem:[#allocation2] sm:$0x3] %vm289_vm4, %v299_v10 }
 0x2b9   :  { %378 = shalt.err (!%p375_p4)
}
 0x2ba   :  { %s379_s29 = scalar_lea.hbm %s504_s7, 32 }
 0x2bb   :  { %p380_p5 = scmp.ne.s32.totalorder %s504_s7, %s379_s29  ;;  %p383_p6 = scmp.lt.u32.totalorder %s379_s29, %s504_s7 }
 0x2bd   :  { %p385_p7 = pnand %p383_p6, %p380_p5 }
 0x2bf   :  { %388 = shalt.err (!%p385_p7)
}
 0x2c0   :  { %310 = dma.vmem_to_hbm [thread:$0]  %s308_s25, 32, %s504_s7, [#allocation3]  }
 0x2c1   :  { %389 = dma.done.wait [#allocation3], 32  }
 0x2c2   :  { %390 = vsyncadd [#allocation3], 4294967264 }
 0x2c3   :  { %314 = vsyncpa [#allocation3], 1 }

</bundles_post_ra>
